<compile_context>
chip_gen: v7x
topology: tpu7x:2x2x1
jax: 0.10.0
libtpu: 0.0.40
codegen_flags: <defaults>
</compile_context>

<pallas_src>
import jax
import jax.numpy as jnp
import numpy as np
from jax.experimental import pallas as pl
from jax.experimental.pallas import tpu as pltpu


# ---------------------------------------------------------------------------
# Kernels
# ---------------------------------------------------------------------------
def _linear1x1_bias_kernel(x_ref, w_ref, b_ref, o_ref):
    # x_ref: (TN, C, TS)  w_ref: (c_out, C)  b_ref: (c_out, 1)  o_ref: (TN, c_out, TS)
    w = w_ref[...]
    b = b_ref[...]
    # TN is a small compile-time constant (<= 16): statically unrolled matmuls.
    for n in range(x_ref.shape[0]):
        acc = jnp.dot(w, x_ref[n], preferred_element_type=jnp.float32)  # MXU, f32 acc
        o_ref[n] = (acc + b).astype(o_ref.dtype)                        # bias in f32, then cast


def _linear1x1_nobias_kernel(x_ref, w_ref, o_ref):
    w = w_ref[...]
    for n in range(x_ref.shape[0]):
        acc = jnp.dot(w, x_ref[n], preferred_element_type=jnp.float32)
        o_ref[n] = acc.astype(o_ref.dtype)


# ---------------------------------------------------------------------------
# Tiling / VMEM sizing
# ---------------------------------------------------------------------------
def _vmem_limit_bytes():
    """Half of physical VMEM (capped at 128 MiB): 32 MiB on v7x, 64 MiB on v5e/v6e."""
    cap = 64 << 20  # conservative fallback = v7x per-TC VMEM
    try:
        info = pltpu.get_tpu_info()
        cap = int(getattr(info, "vmem_capacity_bytes", cap))
    except Exception:
        pass
    return int(min(cap, 128 << 20) // 2)


def _largest_divisor_leq(n, cap):
    cap = max(1, min(n, cap))
    for d in range(cap, 0, -1):
        if n % d == 0:
            return d
    return 1


def _choose_tiling(N, C, c_out, S, itemsize, vmem_limit):
    """Pick (TN, TS): batch block and lane-dense spatial tile."""
    s128 = pl.cdiv(S, 128) * 128                 # lane-dense padded spatial extent
    per_elem = (C + c_out) * itemsize            # HBM bytes per (batch, spatial) element

    # Double-buffered x + out tiles must fit with headroom inside the scoped limit.
    budget_elems = max(128, int(0.8 * vmem_limit) // (2 * per_elem))   # cap on TN*TS

    # Spatial tile: largest lane-dense tile within budget; overhead is fully
    # amortised well before 8192 lanes.
    ts_cap = max(128, (min(budget_elems, 8192) // 128) * 128)
    ts = min(s128, ts_cap)

    # Batch block: pull several batch elements into one step so each grid step
    # moves >= ~2 MiB of HBM traffic (unrolled loop capped at 16 matmuls).
    target_elems = max(1, (2 << 20) // per_elem)
    tn_cap = max(1, min(budget_elems // ts, pl.cdiv(target_elems, ts), 16))
    tn = _largest_divisor_leq(N, tn_cap)

    # Guarantee >= 2 "parallel" grid steps so v7x can use both TensorCores.
    if (N // tn) * pl.cdiv(S, ts) < 2:
        if s128 >= 256:
            ts = max(128, ((s128 // 2) // 128) * 128)
        elif N >= 2:
            tn = _largest_divisor_leq(N, max(1, tn // 2))
    return tn, ts


# ---------------------------------------------------------------------------
# Wrapper
# ---------------------------------------------------------------------------
def linear1x1_forward(x, w, b=None):
    """x: (N, C, H, W); w: (c_out, C, 1, 1) Conv2d weight; b: (c_out,) or None."""
    N, C, H, W = x.shape
    c_out = w.shape[0]
    S = H * W
    itemsize = jnp.dtype(x.dtype).itemsize

    vmem_limit = _vmem_limit_bytes()
    TN, TS = _choose_tiling(N, C, c_out, S, itemsize, vmem_limit)

    grid_n = N // TN                    # TN divides N by construction
    grid_s = pl.cdiv(S, TS)
    S_pad = grid_s * TS

    x2 = x.reshape(N, C, S)             # contiguous reshape, no transpose
    if S_pad != S:
        x2 = jnp.pad(x2, ((0, 0), (0, 0), (0, S_pad - S)))
    w2 = w.reshape(c_out, C)

    flops = 2 * C * c_out * N * S
    bytes_accessed = ((C + c_out) * N * S * itemsize
                      + c_out * C * jnp.dtype(w.dtype).itemsize)
    if b is not None:
        bytes_accessed += c_out * jnp.dtype(b.dtype).itemsize
    cost = pl.CostEstimate(flops=flops, transcendentals=0,
                           bytes_accessed=bytes_accessed)

    compiler_params = pltpu.CompilerParams(
        dimension_semantics=("parallel", "parallel"),
        vmem_limit_bytes=vmem_limit,
    )

    x_spec = pl.BlockSpec((TN, C, TS), lambda n, s: (n, 0, s))
    w_spec = pl.BlockSpec((c_out, C), lambda n, s: (0, 0))       # resident weight tile
    o_spec = pl.BlockSpec((TN, c_out, TS), lambda n, s: (n, 0, s))
    out_shape = jax.ShapeDtypeStruct((N, c_out, S_pad), x.dtype)

    if b is not None:
        b2 = b.reshape(c_out, 1)
        b_spec = pl.BlockSpec((c_out, 1), lambda n, s: (0, 0))
        out2 = pl.pallas_call(
            _linear1x1_bias_kernel,
            out_shape=out_shape,
            grid_spec=pltpu.PrefetchScalarGridSpec(
                num_scalar_prefetch=0,
                grid=(grid_n, grid_s),
                in_specs=[x_spec, w_spec, b_spec],
                out_specs=o_spec),
            compiler_params=compiler_params,
            cost_estimate=cost,
        )(x2, w2, b2)
    else:
        out2 = pl.pallas_call(
            _linear1x1_nobias_kernel,
            out_shape=out_shape,
            grid_spec=pltpu.PrefetchScalarGridSpec(
                num_scalar_prefetch=0,
                grid=(grid_n, grid_s),
                in_specs=[x_spec, w_spec],
                out_specs=o_spec),
            compiler_params=compiler_params,
            cost_estimate=cost,
        )(x2, w2)

    if S_pad != S:
        out2 = out2[:, :, :S]
    return out2.reshape(N, c_out, H, W)


def reference_forward(x, w, b):
    """Pure-JAX reference mirroring the PyTorch 1x1 Conv2d."""
    w2 = w.reshape(w.shape[0], w.shape[1])
    out = jnp.einsum('oc,nchw->nohw', w2, x)
    if b is not None:
        out = out + b[None, :, None, None]
    return out


if __name__ == "__main__":
    key = jax.random.PRNGKey(0)
    # Shapes consistent with MTGNN usage: (batch, channels, nodes, seq).
    N, C_in, H, W = 2, 4, 16, 16
    c_out = 8

    k1, k2, k3 = jax.random.split(key, 3)
    x = jax.random.normal(k1, (N, C_in, H, W), dtype=jnp.float32)
    # Conv2d(c_in, c_out, kernel_size=(1,1)) weight and bias.
    w = 0.1 * jax.random.normal(k2, (c_out, C_in, 1, 1), dtype=jnp.float32)
    b = 0.1 * jax.random.normal(k3, (c_out,), dtype=jnp.float32)

    out = linear1x1_forward(x, w, b)
    out = jax.block_until_ready(out)

    ref = reference_forward(x, w, b)
    assert out.shape == (N, c_out, H, W)
    assert np.allclose(np.asarray(out), np.asarray(ref), rtol=1e-5, atol=1e-5), \
        "Pallas kernel mismatch vs reference"

    print("KERNEL_OK")
</pallas_src>

<mosaic_0001>
module attributes {stable_mosaic.version = 11 : i64} {
  func.func @_linear1x1_bias_kernel(%arg0: i32, %arg1: i32, %arg2: memref<2x4x128xf32, #tpu.memory_space<vmem>>, %arg3: memref<8x4xf32, #tpu.memory_space<vmem>>, %arg4: memref<8x1xf32, #tpu.memory_space<vmem>>, %arg5: memref<2x8x128xf32, #tpu.memory_space<vmem>>) attributes {dimension_semantics = [#tpu.dimension_semantics<parallel>, #tpu.dimension_semantics<parallel>], iteration_bounds = array<i64: 1, 2>, scalar_prefetch = 0 : i64, scratch_operands = 0 : i64, tpu.core_type = #tpu.core_type<tc>, window_params = [{transform_indices = @transform_0, window_bounds = array<i64: 2, 4, 128>}, {pipeline_mode = #tpu.pipeline_mode<synchronous>, transform_indices = @transform_1, window_bounds = array<i64: 8, 4>}, {pipeline_mode = #tpu.pipeline_mode<synchronous>, transform_indices = @transform_2, window_bounds = array<i64: 8, 1>}, {transform_indices = @transform_3, window_bounds = array<i64: 2, 8, 128>}]} {
    %c0 = arith.constant 0 : index
    %c0_0 = arith.constant 0 : index
    %0 = vector.load %arg3[%c0, %c0_0] : memref<8x4xf32, #tpu.memory_space<vmem>>, vector<8x4xf32>
    %c0_1 = arith.constant 0 : index
    %c0_2 = arith.constant 0 : index
    %1 = vector.load %arg4[%c0_1, %c0_2] : memref<8x1xf32, #tpu.memory_space<vmem>>, vector<8x1xf32>
    %c0_3 = arith.constant 0 : index
    %c0_4 = arith.constant 0 : index
    %c0_5 = arith.constant 0 : index
    %2 = vector.load %arg2[%c0_3, %c0_4, %c0_5] : memref<2x4x128xf32, #tpu.memory_space<vmem>>, vector<1x4x128xf32>
    %3 = vector.shape_cast %2 : vector<1x4x128xf32> to vector<4x128xf32>
    %cst = arith.constant dense<0.000000e+00> : vector<8x128xf32>
    %4 = tpu.matmul %0, %3, %cst {dimension_numbers = #tpu.dot_dimension_numbers<[1], [0], [0], [1], [0, 0, 1, 1], [], []>} : vector<8x4xf32>, vector<4x128xf32>, vector<8x128xf32> -> vector<8x128xf32>
    %5 = vector.broadcast %1 : vector<8x1xf32> to vector<8x128xf32>
    %6 = arith.addf %4, %5 : vector<8x128xf32>
    %c0_6 = arith.constant 0 : index
    %c0_7 = arith.constant 0 : index
    %c0_8 = arith.constant 0 : index
    %7 = vector.load %arg5[%c0_6, %c0_7, %c0_8] : memref<2x8x128xf32, #tpu.memory_space<vmem>>, vector<1x8x128xf32>
    %8 = vector.shape_cast %7 : vector<1x8x128xf32> to vector<8x128xf32>
    %9 = vector.shape_cast %6 : vector<8x128xf32> to vector<1x8x128xf32>
    tpu.vector_store %arg5[%c0_6, %c0_7, %c0_8], %9 {strides = array<i32>} : memref<2x8x128xf32, #tpu.memory_space<vmem>>, vector<1x8x128xf32>,
    %c1 = arith.constant 1 : index
    %c0_9 = arith.constant 0 : index
    %c0_10 = arith.constant 0 : index
    %10 = vector.load %arg2[%c1, %c0_9, %c0_10] : memref<2x4x128xf32, #tpu.memory_space<vmem>>, vector<1x4x128xf32>
    %11 = vector.shape_cast %10 : vector<1x4x128xf32> to vector<4x128xf32>
    %cst_11 = arith.constant dense<0.000000e+00> : vector<8x128xf32>
    %12 = tpu.matmul %0, %11, %cst_11 {dimension_numbers = #tpu.dot_dimension_numbers<[1], [0], [0], [1], [0, 0, 1, 1], [], []>} : vector<8x4xf32>, vector<4x128xf32>, vector<8x128xf32> -> vector<8x128xf32>
    %13 = vector.broadcast %1 : vector<8x1xf32> to vector<8x128xf32>
    %14 = arith.addf %12, %13 : vector<8x128xf32>
    %c1_12 = arith.constant 1 : index
    %c0_13 = arith.constant 0 : index
    %c0_14 = arith.constant 0 : index
    %15 = vector.load %arg5[%c1_12, %c0_13, %c0_14] : memref<2x8x128xf32, #tpu.memory_space<vmem>>, vector<1x8x128xf32>
    %16 = vector.shape_cast %15 : vector<1x8x128xf32> to vector<8x128xf32>
    %17 = vector.shape_cast %14 : vector<8x128xf32> to vector<1x8x128xf32>
    tpu.vector_store %arg5[%c1_12, %c0_13, %c0_14], %17 {strides = array<i32>} : memref<2x8x128xf32, #tpu.memory_space<vmem>>, vector<1x8x128xf32>,
    return
  }
  func.func @transform_0(%arg0: i32, %arg1: i32) -> (i32, i32, i32) {
    %c0_i32 = arith.constant 0 : i32
    %c0_i32_0 = arith.constant 0 : i32
    return %arg0, %c0_i32, %arg1 : i32, i32, i32
  }
  func.func @transform_1(%arg0: i32, %arg1: i32) -> (i32, i32) {
    %c0_i32 = arith.constant 0 : i32
    %c0_i32_0 = arith.constant 0 : i32
    %c0_i32_1 = arith.constant 0 : i32
    return %c0_i32, %c0_i32_0 : i32, i32
  }
  func.func @transform_2(%arg0: i32, %arg1: i32) -> (i32, i32) {
    %c0_i32 = arith.constant 0 : i32
    %c0_i32_0 = arith.constant 0 : i32
    %c0_i32_1 = arith.constant 0 : i32
    return %c0_i32, %c0_i32_0 : i32, i32
  }
  func.func @transform_3(%arg0: i32, %arg1: i32) -> (i32, i32, i32) {
    %c0_i32 = arith.constant 0 : i32
    %c0_i32_0 = arith.constant 0 : i32
    return %arg0, %c0_i32, %arg1 : i32, i32, i32
  }
}

</mosaic_0001>

<bundles_post_ra>
// kernel: tpu_custom_call.1
= control target key start
LH: loop header
LB: loop body
LE: loop exit
PB: predicated region body
PF: predicated region fallthrough
CT: control target
= control target key end

     0   :  { %8 = vsyncpa [#allocation4], 0  ;;  %s827_s0 = inlined_call_operand.vmem [shape: f32[2,4,256], index: 0, kind: input, shape index: {}]   ;;  %s828_s1 = inlined_call_operand.vmem [shape: f32[8,4], index: 1, kind: input, shape index: {}]   ;;  %s829_s2 = inlined_call_operand.vmem [shape: f32[8,1], index: 2, kind: input, shape index: {}]   ;;  %s830_s3 = inlined_call_operand.hbm [shape: f32[2,8,256], index: 3, kind: output, shape index: {}]  }
   0x1   :  { %10 = vsyncpa [#allocation4 + $0x1], 0  ;;  %s697_s12 = smov 0   ;;  %s699_s13 = smov 0  }
   0x2   :  { %s701_s14 = smov 0   ;;  %s703_s15 = smov 0  }
   0x3   :  { %s705_s16 = smov 0   ;;  %s707_s17 = smov 0  }
   0x4 LB: > { %s495_s18 = sadd.s32 4294967295, %s668_s17   ;;  %s496_s19 = sadd.s32 4294967294, %s668_s17   ;;  %s668_s17 = sphi %s707_s17, %s16_s17   ;;  %s664_s16 = sphi %s705_s16, %s837_s16   ;;  %s660_s15 = sphi %s703_s15, %s836_s15   ;;  %s656_s14 = sphi %s701_s14, %s835_s14   ;;  %s652_s13 = sphi %s699_s13, %s834_s13   ;;  %s648_s12 = sphi %s697_s12, %s833_s12  }
   0x5   : > { %s25_s20 = sadd.s32 1, %s664_s16  ;;  %s37_s21 = sadd.s32 1, %s656_s14 }
   0x6   : > { %p26_p0 = scmp.ge.s32.totalorder %s25_s20, 2  ;;  %p44_p1 = scmp.ne.s32.totalorder %s656_s14, %s652_s13 }
   0x7   : > { %p45_p2 = scmp.eq.s32.totalorder %s668_s17, 0  ;;  %p118_p3 = scmp.eq.s32.totalorder %s495_s18, 1 }
   0x8   : > { %s839_s20 = smov (%p26_p0, %s25_s20), 0  ;;  %p123_p6 = scmp.ne.s32.totalorder %s652_s13, %s648_s12 }
   0x9   : > { %p46_p4 = por %p45_p2, %p44_p1  ;;  %p736_p5 = por %p118_p3, %p44_p1 }
   0xa   : > { %s33_s23 = ssub.s32 %s664_s16, %s839_s20  ;;  %p124_p8 = scmp.eq.s32.totalorder %s496_s19, 1 }
   0xb   : > { %p35_p7 = scmp.eq.s32.totalorder %s33_s23, 0  ;;  %p498_p10 = scmp.ge.s32.totalorder %s668_s17, 2 }
   0xc   : > { %p747_p9 = por %p124_p8, %p123_p6 }
   0xd   : > { %s745_s24 = scalar_select %p35_p7, %s656_s14, %s37_s21  }
   0xe   : > { %146 = sbr.rel (%p498_p10) target bundleno = 28 (0x1c), region = 24 }
  0x15   : > { %149 = sbr.rel (!%p46_p4) target bundleno = 28 (0x1c), region = 28  ;;  %s151_s26 = sand.u32 (%p46_p4), 1, %s656_s14  }
  0x16   : > { %s500_s27 = sshll.u32 (%p46_p4), %s664_s16, 2  ;;  %s499_s28 = sshll.u32 (%p46_p4), %s151_s26, 3 }
  0x17   : > { %s158_s4 = scalar_lea.vmem (%p46_p4), %s827_s0, %s500_s27  ;;  %s153_s5 = scalar_lea.vmem (%p46_p4), [#allocation2], %s499_s28 }
  0x18   : > { %v174_v0 = vld [vmem:[%s158_s4] sm:$0xf] (%p46_p4)  ;;  %v176_v1 = vld [vmem:[%s158_s4 + $0x8] sm:$0xf] (%p46_p4) }
  0x19   : > { %175 = vst [vmem:[%s153_s5] sm:$0xf] (%p46_p4), %v174_v0  ;;  %177 = vst [vmem:[%s153_s5 + $0x4] sm:$0xf] (%p46_p4), %v176_v1 }
  0x1c PF: > { %p501_p11 = scmp.ge.s32.totalorder %s668_s17, 1  ;;  %p203_p12 = scmp.lt.s32.totalorder %s668_s17, 3 }
  0x1e   : > { %p204_p13 = pnand %p501_p11, %p203_p12 }
  0x1f   : > { %s762_s6 = sand.u32 (!%p204_p13), 1, %s652_s13   ;;  %v670_v2 = vmov (!%p204_p13), 0.0   ;;  %vm247_vm0 = vcmask (!%p204_p13), 1043456   ;;  %vm671_vm1 = vmmov (!%p204_p13), 0   ;;  %v235_v3 = vld [vmem:[%s828_s1] sm:$0xff] (!%p204_p13)  ;;  %vm243_vm2 = vcmask (!%p204_p13), 31744  }
  0x20   : > { %207 = sbr.rel (%p204_p13) target bundleno = 266 (0x10a), region = 69  ;;  %518 = vmatprep.subr.mxu0 (!%p204_p13), %v670_v2  ;;  %523 = vmatprep.subr.mxu1 (!%p204_p13), %v670_v2  ;;  %s502_s7 = sshll.u32 (!%p204_p13), %s762_s6, 3  ;;  %v672_v6 = vmov (!%p204_p13), 0   ;;  %v236_v7 = vld [vmem:[%s829_s2] sm:$0xff] (!%p204_p13) }
  0x21   : > { %520 = vmatprep.mubr.msk.f32.mxu0 (!%p204_p13), %vm671_vm1, %v670_v2  ;;  %525 = vmatprep.mubr.msk.f32.mxu1 (!%p204_p13), %vm671_vm1, %v670_v2  ;;  %s212_s10 = scalar_lea.vmem (!%p204_p13), [#allocation2], %s502_s7  ;;  %s503_s19 = sshll.u32 (!%p204_p13), %s762_s6, 4 }
  0x22   : > { %v237_v4 = vld [vmem:[%s212_s10] sm:$0xf] (!%p204_p13)  ;;  %v506_v5 = vld [vmem:[%s212_s10 + $0x4] sm:$0xf] (!%p204_p13)  ;;  %589 = vset.pattern.permute.xlu0 (!%p204_p13), %v672_v6  ;;  %s232_s21 = scalar_lea.vmem (!%p204_p13), [#allocation3], %s503_s19  ;;  %s511_s26 = sshll.u32 (!%p204_p13), %s660_s15, 7 }
  0x23   : > { %519 = vmatpush3.msk.msra.mxu0 (!%p204_p13), %vm247_vm0, %v237_v4  ;;  %524 = vmatpush3.msk.msra.mxu1 (!%p204_p13), %vm247_vm0, %v506_v5  ;;  %s415_s23 = sshll.u32 (!%p204_p13), %s232_s21, 4  ;;  %s778_s29 = scalar_lea.hbm (!%p204_p13), %s830_s3, %s511_s26  ;;  %s773_s23 = int_to_ptr.vmem [resolvable:$true] %s415_s23 }
  0x24   : > { %521 = vmatmul.mubr.msk.f32.vlgmr.msra.gmra.mrb[0].mxu0 (!%p204_p13), %vm243_vm2, %v235_v3  ;;  %526 = vmatmul.mubr.msk.f32.vlgmr.msra.gmra.mrb[0].mxu1 (!%p204_p13), %vm243_vm2, %v235_v3  ;;  %s400_s15 = scalar_lea.sflag (!%p204_p13), [#allocation4], %s762_s6  ;;  %s590_s30 = scalar_lea.vmem (!%p204_p13), %s773_s23, 256 }
  0x25   : > { %240 = vperm.xlu0 (!%p204_p13), %589, %v236_v7   ;;  %p591_p0 = scmp.ne.s32.totalorder (!%p204_p13), %s773_s23, %s590_s30  ;;  %s673_s4 = smov (!%p204_p13), [#allocation3]  }
  0x26   : > { %s594_s5 = sshll.u32 (!%p204_p13), %s673_s4, 4  ;;  %s595_s5 = int_to_ptr.vmem [resolvable:$false] %s594_s5 }
  0x27   : > { %p592_p1 = pnand %p591_p0, %p736_p5  ;;  %s596_s7 = scalar_lea.vmem %s595_s5, 512 }
  0x28   : > { %p597_p3 = scmp.lt.s32.totalorder %s773_s23, %s595_s5  ;;  %p598_p4 = scmp.lt.s32.totalorder %s596_s7, %s590_s30 }
  0x29   : > { %p593_p2 = pneg %p592_p1 }
  0x2a   : > { %p599_p6 = por %p598_p4, %p597_p3 }
  0x2c   : > { %p600_p7 = pnand %p599_p6, %p593_p2 }
  0xa4   : > { %v241_v8 = vpop.permute.xlu0 %240 }
  0xf7   : > { %v317_v9 = vpop.f32.mrb[0].mxu0  ;;  %v393_v10 = vpop.f32.mrb[0].mxu1 }
  0xf8   : > { %v318_v11 = vadd.f32 %v317_v9, %v241_v8  ;;  %v394_v12 = vadd.f32 %v393_v10, %v241_v8  ;;  %v522_v13 = vpop.f32.mrb[1].mxu0  ;;  %v527_v14 = vpop.f32.mrb[1].mxu1 }
  0xfa   : > { %321 = vst [vmem:[%s232_s21] sm:$0xff] %v318_v11  ;;  %509 = vst [vmem:[%s232_s21 + $0x8] sm:$0xff] %v394_v12 }
  0xfb   : > { %603 = shalt.err (!%p600_p7)
}
  0xfc   : > { %s604_s8 = scalar_lea.hbm %s778_s29, 256  ;;  %s608_s11 = scalar_lea.hbm %s830_s3, 512 }
  0xfd   : > { %p605_p8 = scmp.ne.s32.totalorder %s778_s29, %s604_s8  ;;  %p609_p13 = scmp.lt.u32.totalorder %s778_s29, %s830_s3 }
  0xfe   : > { %p610_p0 = scmp.lt.u32.totalorder %s608_s11, %s604_s8  ;;  %p612_p2 = scmp.lt.u32.totalorder %s604_s8, %s778_s29 }
  0xff   : > { %p606_p11 = pnand %p605_p8, %p736_p5 }
 0x100   : > { %p611_p1 = por %p610_p0, %p609_p13 }
 0x101   : > { %p607_p12 = pneg %p606_p11 }
 0x102   : > { %p613_p3 = por %p612_p2, %p611_p1 }
 0x104   : > { %p614_p4 = pnand %p613_p3, %p607_p12 }
 0x106   : > { %617 = shalt.err (!%p614_p4)
}
 0x107   : > { %s674_s21 = smov 128   ;;  %s675_s26 = smov 256  }
 0x108   : > { %s676_s27 = smov 8  }
 0x109   : > { %528 = dma.vmem_to_hbm [thread:$0]  (%p736_p5), %s773_s23, 256, %s778_s29, %s400_s15, %s674_s21, %s675_s26, %s676_s27  }
 0x10a PF: > { %s430_s28 = sand.u32 1, %s648_s12   ;;  %p531_p6 = pnand %p498_p10, %p747_p9 }
 0x10b   : > { %s431_s30 = scalar_lea.sflag [#allocation4], %s430_s28 }
 0x10c   : > { %643 = dma.done.wait (!%p531_p6), %s431_s30, 256  }
 0x10d   : > { %645 = vsyncadd (!%p531_p6), %s431_s30, 4294967040  ;;  %s16_s17 = sadd.s32 1, %s668_s17   ;;  %s833_s12 = smov %s652_s13 }
 0x10e   : > { %p13_p7 = scmp.ge.s32.totalorder %s16_s17, 4   ;;  %s834_s13 = smov %s656_s14 }
 0x10f   : > { %s835_s14 = smov %s745_s24  ;;  %s836_s15 = smov %s664_s16 }
 0x110   : > { %s837_s16 = smov %s839_s20  ;;  %15 = sbr.rel (!%p13_p7) target bundleno = 4 (0x4), region = 115 }
 0x117   :  { %436 = vsyncpa [#allocation4], 1 }
 0x118   :  { %438 = vsyncpa [#allocation4 + $0x1], 1 }

</bundles_post_ra>
